<compile_context>
chip_gen: v5e
topology: v5e:2x2
jax: 0.10.0
libtpu: 0.0.40
codegen_flags: <defaults>
</compile_context>

<pallas_src>
import jax
import jax.numpy as jnp
from jax.experimental import pallas as pl
from jax.experimental.pallas import tpu as pltpu


# --------------------------------------------------------------------------
# Kernels
# --------------------------------------------------------------------------
def _layer1_partial_kernel(x_ref, w1_ref, part_ref, acc_ref):
    """K-streamed layer-1 partial sums.

    Grid = (S, kt_per_split):
      axis 0 ("parallel"): K-range split -> one partial per TensorCore
      axis 1 ("arbitrary"): streams the IN dimension
    x tile  (B, TK)  bf16, w1 tile (TK, H1) bf16, acc (B, H1) f32 scratch.
    The per-split partial is written to its own row of the (S, B, H1) output
    on the last K step of that split.
    """
    k = pl.program_id(1)

    @pl.when(k == 0)
    def _init():
        acc_ref[...] = jnp.zeros_like(acc_ref)

    acc_ref[...] += jnp.dot(x_ref[...], w1_ref[...],
                            preferred_element_type=jnp.float32)

    @pl.when(k == pl.num_programs(1) - 1)
    def _store():
        part_ref[...] = acc_ref[...]


def _head_kernel(parts_ref, b1_ref, w2_ref, b2_ref, w3_ref, b3_ref, o_ref):
    """Combine K-split partials + biases + layers 2/3, all resident, all f32."""
    h1 = jnp.sum(parts_ref[...], axis=0) + b1_ref[...]                    # (B, H1)
    h2 = jnp.dot(h1, w2_ref[...],
                 preferred_element_type=jnp.float32) + b2_ref[...]        # (B, F)
    # Final (F -> 1) layer: VPU multiply + lane reduction (no 1-lane matmul).
    h3 = jnp.sum(h2 * w3_ref[...], axis=-1, keepdims=True) + b3_ref[...]  # (B, 1)
    o_ref[...] = h3.astype(o_ref.dtype)


# --------------------------------------------------------------------------
# Tiling / VMEM-budget helpers
# --------------------------------------------------------------------------
def _vmem_limit_bytes():
    """Generation-conditional scoped-VMEM limit (48 MiB on v7x, ~96 MiB else)."""
    cap = None
    try:
        info = pltpu.get_tpu_info()
        cap = getattr(info, "vmem_capacity_bytes", None)
    except Exception:
        cap = None
    if not cap:
        cap = 64 << 20  # conservative default = v7x physical VMEM per core
    return int(min(cap * 3 // 4, 110 << 20))


def _derive_tk(in_dim, batch, h1_dim, vmem_limit_bytes):
    """Largest 128-multiple K tile dividing in_dim that fits the VMEM budget,
    accounting for double-buffered bf16 x (B, tk) and W1 (tk, H1) tiles."""
    per_col = 2 * 2 * (batch + h1_dim)              # bytes of streamed VMEM per tk
    fixed = 2 * batch * h1_dim * 4 + (1 << 20)      # acc + out block + slack
    budget = max(vmem_limit_bytes - fixed, 1 << 20)
    tk_cap = max((budget // per_col) // 128 * 128, 128)
    tk_cap = min(tk_cap, 32768)                     # diminishing returns past this
    if in_dim <= tk_cap:
        return in_dim
    tk = tk_cap
    while tk >= 128:
        if in_dim % tk == 0:
            return tk
        tk -= 128
    # TODO(synk): zero-pad IN to a 128-multiple instead of a single huge block
    # when no aligned divisor exists (never triggers for 3*512*512).
    return in_dim


# --------------------------------------------------------------------------
# Forward pass
# --------------------------------------------------------------------------
def feature_vector_model_forward(x_nchw, params, *, tk=None, num_k_splits=None):
    """Forward pass of FeatureVectorModel.

    x_nchw: (B, C, H, W) float32
    params: w1 (IN, H1) [ideally stored bf16], b1 (H1,), w2 (H1, F), b2 (F,),
            w3 (F,), b3 (1,)   -- weights pre-transposed to (in, out) layout.
    returns: squeeze of (B, 1) -> (B,), matching torch.squeeze.
    """
    B = x_nchw.shape[0]
    x_flat = x_nchw.reshape(B, -1).astype(jnp.bfloat16)   # nn.Flatten; tiny vs W1
    in_dim = x_flat.shape[1]

    w1 = params["w1"]
    if w1.dtype != jnp.bfloat16:
        # Fallback only -- store W1 in bf16 once (init_params does) so the
        # dominant HBM stream is not duplicated by a per-call cast pass.
        w1 = w1.astype(jnp.bfloat16)
    b1 = params["b1"].reshape(1, -1).astype(jnp.float32)   # (1, H1)
    w2 = params["w2"].astype(jnp.float32)                  # (H1, F)
    b2 = params["b2"].reshape(1, -1).astype(jnp.float32)   # (1, F)
    w3 = params["w3"].reshape(1, -1).astype(jnp.float32)   # (1, F)
    b3 = params["b3"].reshape(1, 1).astype(jnp.float32)    # (1, 1)

    h1_dim = w1.shape[1]

    vmem_limit = _vmem_limit_bytes()
    if tk is None:
        tk = _derive_tk(in_dim, B, h1_dim, vmem_limit)
    assert in_dim % tk == 0, (in_dim, tk)
    kt = in_dim // tk

    # K-range split: 2-way when possible so both v7x TensorCores stream
    # disjoint halves of W1; harmless sequential iteration on v5e/v6e.
    if num_k_splits is None:
        num_k_splits = 2 if (kt % 2 == 0 and kt >= 2) else 1
    assert kt % num_k_splits == 0, (kt, num_k_splits)
    kps = kt // num_k_splits

    flops = 2 * B * in_dim * h1_dim
    bytes_accessed = (x_flat.size * 2 + w1.size * 2
                      + num_k_splits * B * h1_dim * 4)

    parts = pl.pallas_call(
        _layer1_partial_kernel,
        out_shape=jax.ShapeDtypeStruct((num_k_splits, B, h1_dim), jnp.float32),
        grid_spec=pltpu.PrefetchScalarGridSpec(
            num_scalar_prefetch=0,
            grid=(num_k_splits, kps),
            in_specs=[
                pl.BlockSpec((B, tk), lambda c, k: (0, c * kps + k)),       # x
                pl.BlockSpec((tk, h1_dim), lambda c, k: (c * kps + k, 0)),  # w1
            ],
            out_specs=pl.BlockSpec((None, B, h1_dim), lambda c, k: (c, 0, 0)),
            scratch_shapes=[pltpu.VMEM((B, h1_dim), jnp.float32)],
        ),
        compiler_params=pltpu.CompilerParams(
            dimension_semantics=("parallel", "arbitrary"),
            vmem_limit_bytes=vmem_limit,
        ),
        cost_estimate=pl.CostEstimate(
            flops=flops, transcendentals=0, bytes_accessed=bytes_accessed),
    )(x_flat, w1)

    # Tiny head: partial combine + biases + layers 2/3. Everything resident.
    out = pl.pallas_call(
        _head_kernel,
        out_shape=jax.ShapeDtypeStruct((B, 1), jnp.float32),
    )(parts, b1, w2, b2, w3, b3)

    return jnp.squeeze(out)


# --------------------------------------------------------------------------
# Params
# --------------------------------------------------------------------------
def init_params(key, in_dim, hidden, n_features):
    """PyTorch-Linear-style uniform(-1/sqrt(fan_in), +) init.

    W1 is stored in bf16 once (the kernel's native stream dtype) so forward
    passes never pay an extra f32->bf16 cast over the ~huge W1.
    """
    ks = jax.random.split(key, 6)

    def unif(k, shape, fan_in):
        bound = 1.0 / jnp.sqrt(jnp.float32(fan_in))
        return jax.random.uniform(k, shape, jnp.float32, -bound, bound)

    return {
        # stored pre-transposed as (in, out); w3 kept as a row vector
        "w1": unif(ks[0], (in_dim, hidden), in_dim).astype(jnp.bfloat16),
        "b1": unif(ks[1], (hidden,), in_dim),
        "w2": unif(ks[2], (hidden, n_features), hidden),
        "b2": unif(ks[3], (n_features,), hidden),
        "w3": unif(ks[4], (n_features,), n_features),
        "b3": unif(ks[5], (1,), n_features),
    }


if __name__ == "__main__":
    # Small shapes structurally consistent with the module
    # (full-size model would be B x 3 x 512 x 512, hidden 256).
    B, C, H, W = 2, 3, 16, 16
    IN_DIM = C * H * W          # 768
    HIDDEN = 256
    N_FEATURES = 32

    key = jax.random.PRNGKey(0)
    kx, kp = jax.random.split(key)

    x = jax.random.normal(kx, (B, C, H, W), jnp.float32)
    params = init_params(kp, IN_DIM, HIDDEN, N_FEATURES)

    # tk=128 -> kt=6, split 2 ways -> each split runs 3 K steps: exercises the
    # parallel split axis, accumulator init, and epilogue gating.
    y = feature_vector_model_forward(x, params, tk=128, num_k_splits=2)
    y = jax.block_until_ready(y)

    # Pure-JAX reference on the same bf16-stream / f32-accumulate math path.
    x_bf = x.reshape(B, -1).astype(jnp.bfloat16)
    h = jnp.dot(x_bf, params["w1"],
                preferred_element_type=jnp.float32) + params["b1"]
    h = jnp.dot(h, params["w2"],
                preferred_element_type=jnp.float32) + params["b2"]
    ref = jnp.sum(h * params["w3"].reshape(1, -1), axis=-1) + params["b3"]

    assert y.shape == ref.shape == (B,), (y.shape, ref.shape)
    assert jnp.allclose(y, ref, atol=1e-3, rtol=1e-3), (y, ref)

    print("KERNEL_OK")
</pallas_src>

<mosaic_0001>
module attributes {stable_mosaic.version = 11 : i64} {
  func.func @_layer1_partial_kernel(%arg0: i32, %arg1: i32, %arg2: memref<2x128xbf16, #tpu.memory_space<vmem>>, %arg3: memref<128x256xbf16, #tpu.memory_space<vmem>>, %arg4: memref<1x2x256xf32, #tpu.memory_space<vmem>>, %arg5: memref<2x256xf32, #tpu.memory_space<vmem>>) attributes {dimension_semantics = [#tpu.dimension_semantics<parallel>, #tpu.dimension_semantics<arbitrary>], iteration_bounds = array<i64: 2, 3>, scalar_prefetch = 0 : i64, scratch_operands = 1 : i64, tpu.core_type = #tpu.core_type<tc>, window_params = [{transform_indices = @transform_0, window_bounds = array<i64: 2, 128>}, {transform_indices = @transform_1, window_bounds = array<i64: 128, 256>}, {transform_indices = @transform_2, window_bounds = array<i64: 1, 2, 256>}]} {
    %c0_i32 = arith.constant 0 : i32
    %0 = arith.cmpi eq, %arg1, %c0_i32 : i32
    %1 = arith.extui %0 : i1 to i32
    %c0_i32_0 = arith.constant 0 : i32
    %2 = arith.cmpi ne, %1, %c0_i32_0 : i32
    scf.if %2 {
      %cst_9 = arith.constant 0.000000e+00 : f32
      %12 = vector.broadcast %cst_9 : f32 to vector<2x256xf32>
      %c0_10 = arith.constant 0 : index
      %c0_11 = arith.constant 0 : index
      %13 = vector.load %arg5[%c0_10, %c0_11] : memref<2x256xf32, #tpu.memory_space<vmem>>, vector<2x256xf32>
      tpu.vector_store %arg5[%c0_10, %c0_11], %12 {strides = array<i32>} : memref<2x256xf32, #tpu.memory_space<vmem>>, vector<2x256xf32>,
    } else {
    }
    %c0 = arith.constant 0 : index
    %c0_1 = arith.constant 0 : index
    %3 = vector.load %arg5[%c0, %c0_1] : memref<2x256xf32, #tpu.memory_space<vmem>>, vector<2x256xf32>
    %c0_2 = arith.constant 0 : index
    %c0_3 = arith.constant 0 : index
    %4 = vector.load %arg2[%c0_2, %c0_3] : memref<2x128xbf16, #tpu.memory_space<vmem>>, vector<2x128xbf16>
    %c0_4 = arith.constant 0 : index
    %c0_5 = arith.constant 0 : index
    %5 = vector.load %arg3[%c0_4, %c0_5] : memref<128x256xbf16, #tpu.memory_space<vmem>>, vector<128x256xbf16>
    %cst = arith.constant dense<0.000000e+00> : vector<2x256xf32>
    %6 = tpu.matmul %4, %5, %cst {dimension_numbers = #tpu.dot_dimension_numbers<[1], [0], [0], [1], [0, 0, 1, 1], [], []>} : vector<2x128xbf16>, vector<128x256xbf16>, vector<2x256xf32> -> vector<2x256xf32>
    %7 = arith.addf %3, %6 : vector<2x256xf32>
    %c0_6 = arith.constant 0 : index
    %c0_7 = arith.constant 0 : index
    %8 = vector.load %arg5[%c0_6, %c0_7] : memref<2x256xf32, #tpu.memory_space<vmem>>, vector<2x256xf32>
    tpu.vector_store %arg5[%c0_6, %c0_7], %7 {strides = array<i32>} : memref<2x256xf32, #tpu.memory_space<vmem>>, vector<2x256xf32>,
    %c2_i32 = arith.constant 2 : i32
    %9 = arith.cmpi eq, %arg1, %c2_i32 : i32
    %10 = arith.extui %9 : i1 to i32
    %c0_i32_8 = arith.constant 0 : i32
    %11 = arith.cmpi ne, %10, %c0_i32_8 : i32
    scf.if %11 {
      %c0_9 = arith.constant 0 : index
      %c0_10 = arith.constant 0 : index
      %12 = vector.load %arg5[%c0_9, %c0_10] : memref<2x256xf32, #tpu.memory_space<vmem>>, vector<2x256xf32>
      %c0_11 = arith.constant 0 : index
      %c0_12 = arith.constant 0 : index
      %c0_13 = arith.constant 0 : index
      %13 = vector.load %arg4[%c0_11, %c0_12, %c0_13] : memref<1x2x256xf32, #tpu.memory_space<vmem>>, vector<1x2x256xf32>
      %14 = vector.shape_cast %13 : vector<1x2x256xf32> to vector<2x256xf32>
      %15 = vector.shape_cast %12 : vector<2x256xf32> to vector<1x2x256xf32>
      tpu.vector_store %arg4[%c0_11, %c0_12, %c0_13], %15 {strides = array<i32>} : memref<1x2x256xf32, #tpu.memory_space<vmem>>, vector<1x2x256xf32>,
    } else {
    }
    return
  }
  func.func @transform_0(%arg0: i32, %arg1: i32) -> (i32, i32) {
    %c3_i32 = arith.constant 3 : i32
    %0 = arith.muli %arg0, %c3_i32 : i32
    %1 = arith.addi %0, %arg1 : i32
    %c0_i32 = arith.constant 0 : i32
    %c0_i32_0 = arith.constant 0 : i32
    return %c0_i32, %1 : i32, i32
  }
  func.func @transform_1(%arg0: i32, %arg1: i32) -> (i32, i32) {
    %c3_i32 = arith.constant 3 : i32
    %0 = arith.muli %arg0, %c3_i32 : i32
    %1 = arith.addi %0, %arg1 : i32
    %c0_i32 = arith.constant 0 : i32
    %c0_i32_0 = arith.constant 0 : i32
    return %1, %c0_i32 : i32, i32
  }
  func.func @transform_2(%arg0: i32, %arg1: i32) -> (i32, i32, i32) {
    %c0_i32 = arith.constant 0 : i32
    %c0_i32_0 = arith.constant 0 : i32
    %c0_i32_1 = arith.constant 0 : i32
    return %arg0, %c0_i32, %c0_i32_0 : i32, i32, i32
  }
}

</mosaic_0001>

<bundles_post_ra>
// kernel: tpu_custom_call.1
= control target key start
LH: loop header
LB: loop body
LE: loop exit
PB: predicated region body
PF: predicated region fallthrough
CT: control target
= control target key end

     0   :  { %s1159_s0 = inlined_call_operand.hbm [shape: bf16[2,768], index: 0, kind: input, shape index: {}]   ;;  %s1160_s1 = inlined_call_operand.hbm [shape: bf16[768,256], index: 1, kind: input, shape index: {}]   ;;  %s1161_s2 = inlined_call_operand.hbm [shape: f32[2,2,256], index: 2, kind: output, shape index: {}]  }
   0x1   :  { %1166 = sst [smem:[#allocation16_spill]] %s1159_s0 }
   0x2   :  { %7 = vsyncpa [#allocation4], 0 }
   0x3   :  { %9 = vsyncpa [#allocation4 + $0x1], 0 }
   0x4   :  { %10 = vsyncpa [#allocation7], 0 }
   0x5   :  { %12 = vsyncpa [#allocation7 + $0x1], 0 }
   0x6   :  { %13 = vsyncpa [#allocation5], 0 }
   0x7   :  { %15 = vsyncpa [#allocation5 + $0x1], 0  ;;  %s910_s9 = smov 0   ;;  %s912_s10 = smov 0  }
   0x8   :  { %s914_s11 = smov 0   ;;  %s916_s12 = smov 0  }
   0x9   :  { %s918_s13 = smov 0   ;;  %s920_s14 = smov 0  }
   0xa   :  { %s922_s15 = smov 0   ;;  %s924_s16 = smov 0  }
   0xb   :  { %s926_s17 = smov 0   ;;  %s928_s18 = smov 0  }
   0xc   :  { %s930_s19 = smov 0  }
   0xd LB: > { %1167 = sst [smem:[#allocation12_spill]] %s882_s17  ;;  %s493_s20 = sadd.s32 4294967295, %s890_s19   ;;  %s890_s19 = sphi %s930_s19, %s21_s19   ;;  %s886_s18 = sphi %s928_s18, %s1180_s18   ;;  %s882_s17 = sphi %s926_s17, %s1179_s17   ;;  %s878_s16 = sphi %s924_s16, %s1178_s16   ;;  %s874_s15 = sphi %s922_s15, %s1177_s15   ;;  %s870_s14 = sphi %s920_s14, %s1186_s14   ;;  %s866_s13 = sphi %s918_s13, %s1185_s13   ;;  %s862_s12 = sphi %s916_s12, %s1184_s12   ;;  %s858_s11 = sphi %s914_s11, %s1183_s11   ;;  %s854_s10 = sphi %s912_s10, %s1182_s10   ;;  %s850_s9 = sphi %s910_s9, %s1181_s9  }
   0xe   : > { %1168 = sst [smem:[#allocation13_spill]] %s886_s18  ;;  %s494_s21 = sadd.s32 4294967294, %s890_s19  }
   0xf   : > { %s30_s22 = sadd.s32 1, %s882_s17  ;;  %s33_s23 = sadd.s32 1, %s886_s18 }
  0x10   : > { %p31_p0 = scmp.ge.s32.totalorder %s30_s22, 3  ;;  %s37_s24 = smul.u32 3, %s886_s18 }
  0x11   : > { %s44_s25 = sadd.s32 1, %s870_s14  ;;  %p51_p1 = scmp.ne.s32.totalorder %s870_s14, %s866_s13 }
  0x12   : > { %s1188_s22 = smov (%p31_p0, %s30_s22), 0  ;;  %s1190_s23 = smov (!%p31_p0, %s33_s23), %s886_s18 }
  0x13   : > { %1169 = sst [smem:[#allocation14_spill]] %s1188_s22  ;;  %s975_s26 = sadd.s32 %s882_s17, %s37_s24 }
  0x14   : > { %p52_p2 = scmp.eq.s32.totalorder %s890_s19, 0  ;;  %p35_p3 = scmp.ge.s32.totalorder %s1190_s23, 2 }
  0x15   : > { %p57_p4 = scmp.ne.s32.totalorder %s866_s13, %s862_s12  ;;  %p58_p6 = scmp.eq.s32.totalorder %s493_s20, 0 }
  0x16   : > { %p979_p5 = por %p52_p2, %p51_p1  ;;  %s1192_s23 = smov (%p35_p3, %s1190_s23), 0 }
  0x17   : > { %1171 = sst [smem:[#allocation15_spill]] %s1192_s23  ;;  %p985_p7 = por %p58_p6, %p57_p4 }
  0x18   : > { %s100_s29 = sadd.s32 1, %s858_s11  ;;  %s39_s30 = smul.u32 3, %s1192_s23 }
  0x19   : > { %s97_s3 = ssub.s32 %s886_s18, %s1192_s23  ;;  %p110_p9 = scmp.ne.s32.totalorder %s858_s11, %s854_s10 }
  0x1a   : > { %p98_p8 = scmp.eq.s32.totalorder %s97_s3, 0  ;;  %s40_s4 = sadd.s32 %s39_s30, %s1188_s22 }
  0x1b   : > { %p111_p10 = scmp.eq.s32.totalorder %s493_s20, 5  ;;  %s41_s5 = ssub.s32 %s975_s26, %s40_s4 }
  0x1c   : > { %p116_p11 = scmp.ne.s32.totalorder %s854_s10, %s850_s9  ;;  %p42_p12 = scmp.eq.s32.totalorder %s41_s5, 0 }
  0x1d   : > { %p999_p13 = por %p111_p10, %p110_p9  ;;  %p117_p0 = scmp.eq.s32.totalorder %s494_s21, 5 }
  0x1e   : > { %s1004_s7 = scalar_select %p98_p8, %s858_s11, %s100_s29  }
  0x1f   : > { %s1007_s8 = scalar_select %p42_p12, %s870_s14, %s44_s25  }
  0x20   : > { %p611_p1 = scmp.lt.s32.totalorder %s890_s19, 6  ;;  %s1013_s12 = sand.u32 1, %s870_s14  }
  0x21   : > { %p1015_p2 = por %p117_p0, %p116_p11  ;;  %s1175_s0 = sld [smem:[#allocation16_spill]] }
  0x22   : > { %s140_s4 = scalar_lea.vmem [#allocation3], %s1013_s12  ;;  %p1026_p3 = pnand %p611_p1, %p979_p5 }
  0x23   : > { %s149_s25 = sshll.u32 %s140_s4, 4  ;;  %s576_s5 = sshll.u32 %s975_s26, 7  ;;  %s150_s25 = int_to_ptr.vmem [resolvable:$true] %s149_s25 }
  0x24   : > { %s168_s18 = scalar_lea.hbm %s1160_s1, %s576_s5  ;;  %p501_p4 = scmp.ge.s32.totalorder %s890_s19, 1 }
  0x25   : > { %p179_p6 = scmp.lt.s32.totalorder %s890_s19, 7  ;;  %s138_s24 = scalar_lea.sflag [#allocation4], %s1013_s12 }
  0x26   : > { %s497_s30 = sshll.u32 %s1013_s12, 7  ;;  %s892_s17 = smov 128  }
  0x27   : > { %s145_s29 = scalar_lea.hbm %s1175_s0, %s975_s26  ;;  %p180_p8 = pnand %p501_p4, %p179_p6 }
  0x28   : > { %s147_s3 = sshll.u32 %s145_s29, 4  ;;  %s169_s29 = sshll.u32 %s168_s18, 4  ;;  %s148_s3 = int_to_ptr.hbm [resolvable:$true] %s147_s3  ;;  %s170_s29 = int_to_ptr.hbm [resolvable:$true] %s169_s29 }
  0x29   : > { %603 = dma.hbm_to_vmem [thread:$0]  (!%p1026_p3), %s148_s3, 16, %s150_s25, %s138_s24  }
  0x2a   : > { %s160_s27 = scalar_lea.vmem [#allocation6], %s497_s30  ;;  %s157_s0 = scalar_lea.sflag [#allocation7], %s1013_s12 }
  0x2b   : > { %s171_s4 = sshll.u32 %s160_s27, 4  ;;  %s893_s26 = smov 8   ;;  %s172_s4 = int_to_ptr.vmem [resolvable:$true] %s171_s4 }
  0x2c   : > { %606 = dma.hbm_to_vmem [thread:$0]  (!%p1026_p3), %s170_s29, 2048, %s172_s4, %s157_s0, %s892_s17, %s892_s17, %s893_s26  }
  0x2d   : > { %183 = sbr.rel (%p180_p8) target bundleno = 253 (0xfd), region = 28  ;;  %s1044_s22 = sand.u32 (!%p180_p8), 1, %s866_s13  }
  0x2e   : > { %s186_s23 = scalar_lea.sflag (!%p180_p8), [#allocation4], %s1044_s22  ;;  %s188_s3 = scalar_lea.vmem (!%p180_p8), [#allocation3], %s1044_s22 }
  0x32   : > { %837 = dma.done.wait (%p985_p7), %s186_s23, 16  }
  0x33   : > { %839 = vsyncadd (%p985_p7), %s186_s23, 4294967280  ;;  %s502_s18 = sshll.u32 %s1044_s22, 7  ;;  %s195_s12 = scalar_lea.sflag [#allocation7], %s1044_s22 }
  0x34   : > { %s1054_s0 = scalar_lea.vmem [#allocation6], %s502_s18 }
  0x35   : > { %841 = dma.done.wait (%p985_p7), %s195_s12, 2048  }
  0x36   : > { %843 = vsyncadd (%p985_p7), %s195_s12, 4294965248  ;;  %s221_s17 = sand.u32 1, %s854_s10   ;;  %p504_p5 = scmp.ne.s32.totalorder %s874_s15, 0 }
  0x37   : > { %s1063_s25 = sshll.u32 %s221_s17, 2 }
  0x38   : > { %s223_s21 = scalar_lea.vmem [#allocation8], %s1063_s25  ;;  %232 = sbr.rel (%p504_p5) target bundleno = 63 (0x3f), region = 40 }
  0x3d   : > { %v894_v0 = vmov 0.0  }
  0x3e   : > { %233 = vst [vmem:[#allocation2] sm:$0xf] %v894_v0 }
  0x3f PF: > { %v563_v1 = vld [vmem:[%s1054_s0 + $0x70] sm:$0xf]  ;;  %v592_v2 = vld [vmem:[%s1054_s0 + $0x74] sm:$0xf0]  ;;  %v591_v3 = vld [vmem:[%s1054_s0 + $0x74] sm:$0xf] }
  0x40   : > { %v564_v4 = vor.u32 %v592_v2, %v563_v1  ;;  %v565_v5 = vld [vmem:[%s1054_s0 + $0x78] sm:$0xf0]  ;;  %v555_v6 = vld [vmem:[%s1054_s0 + $0x60] sm:$0xf]  ;;  %v590_v7 = vld [vmem:[%s1054_s0 + $0x64] sm:$0xf0] }
  0x41   : > { %v568_v8 = vor.u32 %v591_v3, %v565_v5  ;;  %v589_v9 = vld [vmem:[%s1054_s0 + $0x64] sm:$0xf]  ;;  %v557_v10 = vld [vmem:[%s1054_s0 + $0x68] sm:$0xf0]  ;;  %v556_v11 = vor.u32 %v590_v7, %v555_v6  ;;  %v547_v13 = vld [vmem:[%s1054_s0 + $0x50] sm:$0xf] }
  0x42   : > { %332 = vmatpush.bf16.msra.mxu0 %v564_v4  ;;  %v560_v12 = vor.u32 %v589_v9, %v557_v10  ;;  %v588_v14 = vld [vmem:[%s1054_s0 + $0x54] sm:$0xf0]  ;;  %v587_v15 = vld [vmem:[%s1054_s0 + $0x54] sm:$0xf]  ;;  %v549_v16 = vld [vmem:[%s1054_s0 + $0x58] sm:$0xf0] }
  0x43   : > { %345 = vmatpush.bf16.msra.mxu1 %v568_v8  ;;  %v548_v17 = vor.u32 %v588_v14, %v547_v13  ;;  %v552_v18 = vor.u32 %v587_v15, %v549_v16  ;;  %v539_v19 = vld [vmem:[%s1054_s0 + $0x40] sm:$0xf]  ;;  %v586_v20 = vld [vmem:[%s1054_s0 + $0x44] sm:$0xf0]  ;;  %v585_v21 = vld [vmem:[%s1054_s0 + $0x44] sm:$0xf] }
  0x44   : > { %v541_v22 = vld [vmem:[%s1054_s0 + $0x48] sm:$0xf0]  ;;  %v540_v23 = vor.u32 %v586_v20, %v539_v19  ;;  %v531_v25 = vld [vmem:[%s1054_s0 + $0x30] sm:$0xf]  ;;  %v584_v26 = vld [vmem:[%s1054_s0 + $0x34] sm:$0xf0] }
  0x45   : > { %v544_v24 = vor.u32 %v585_v21, %v541_v22  ;;  %v583_v27 = vld [vmem:[%s1054_s0 + $0x34] sm:$0xf]  ;;  %v533_v28 = vld [vmem:[%s1054_s0 + $0x38] sm:$0xf0]  ;;  %v532_v29 = vor.u32 %v584_v26, %v531_v25  ;;  %v523_v31 = vld [vmem:[%s1054_s0 + $0x20] sm:$0xf] }
  0x46   : > { %333 = vmatpush.bf16.msra.mxu0 %v556_v11  ;;  %v536_v30 = vor.u32 %v583_v27, %v533_v28  ;;  %v582_v32 = vld [vmem:[%s1054_s0 + $0x24] sm:$0xf0]  ;;  %v581_v33 = vld [vmem:[%s1054_s0 + $0x24] sm:$0xf]  ;;  %v525_v34 = vld [vmem:[%s1054_s0 + $0x28] sm:$0xf0] }
  0x47   : > { %346 = vmatpush.bf16.msra.mxu1 %v560_v12  ;;  %v524_v35 = vor.u32 %v582_v32, %v523_v31  ;;  %v528_v36 = vor.u32 %v581_v33, %v525_v34  ;;  %v515_v37 = vld [vmem:[%s1054_s0 + $0x10] sm:$0xf]  ;;  %v580_v38 = vld [vmem:[%s1054_s0 + $0x14] sm:$0xf0]  ;;  %v579_v39 = vld [vmem:[%s1054_s0 + $0x14] sm:$0xf] }
  0x48   : > { %v517_v40 = vld [vmem:[%s1054_s0 + $0x18] sm:$0xf0]  ;;  %v516_v41 = vor.u32 %v580_v38, %v515_v37  ;;  %v507_v43 = vld [vmem:[%s1054_s0] sm:$0xf]  ;;  %v578_v44 = vld [vmem:[%s1054_s0 + $0x4] sm:$0xf0] }
  0x49   : > { %v520_v42 = vor.u32 %v579_v39, %v517_v40  ;;  %v577_v45 = vld [vmem:[%s1054_s0 + $0x4] sm:$0xf]  ;;  %v509_v46 = vld [vmem:[%s1054_s0 + $0x8] sm:$0xf0]  ;;  %v508_v47 = vor.u32 %v578_v44, %v507_v43  ;;  %v235_v49 = vld [vmem:[%s188_s3] sm:$0x1] }
  0x4a   : > { %334 = vmatpush.bf16.msra.mxu0 %v548_v17  ;;  %v512_v48 = vor.u32 %v577_v45, %v509_v46  ;;  %vm361_vm0 = vcmask 1041408   ;;  %v234_v52 = vld [vmem:[#allocation2] sm:$0xf]  ;;  %p569_p7 = scmp.ne.s32.totalorder %s874_s15, 2 }
  0x4b   : > { %347 = vmatpush.bf16.msra.mxu1 %v552_v18 }
  0x4e   : > { %335 = vmatpush.bf16.msra.mxu0 %v540_v23 }
  0x4f   : > { %348 = vmatpush.bf16.msra.mxu1 %v544_v24 }
  0x52   : > { %336 = vmatpush.bf16.msra.mxu0 %v532_v29 }
  0x53   : > { %349 = vmatpush.bf16.msra.mxu1 %v536_v30 }
  0x56   : > { %337 = vmatpush.bf16.msra.mxu0 %v524_v35 }
  0x57   : > { %350 = vmatpush.bf16.msra.mxu1 %v528_v36 }
  0x5a   : > { %338 = vmatpush.bf16.msra.mxu0 %v516_v41 }
  0x5b   : > { %351 = vmatpush.bf16.msra.mxu1 %v520_v42 }
  0x5e   : > { %339 = vmatpush.bf16.msra.mxu0 %v508_v47 }
  0x5f   : > { %352 = vmatpush.bf16.msra.mxu1 %v512_v48 }
  0x61   : > { %340 = vmatmul.bf16.vlgmr.msra.gmra.mxu0 %v235_v49 }
  0x62   : > { %353 = vmatmul.bf16.vlgmr.msra.gmra.mxu1 %v235_v49 }
  0xde   : > { %v341_v50 = vpop.f32.mrf.mxu0 }
  0xdf   : > { %v354_v51 = vpop.f32.mrf.mxu1 }
  0xe0   : > { %v360_v53 = vrot.slane %v354_v51, 6 }
  0xe2   : > { %v362_v54 = vsel %vm361_vm0, %v341_v50, %v360_v53 }
  0xe3   : > { %v364_v55 = vadd.f32 %v362_v54, %v234_v52  ;;  %369 = sbr.rel (%p569_p7) target bundleno = 238 (0xee), region = 44 }
  0xe5   : > { %365 = vst [vmem:[#allocation2] sm:$0xf] %v364_v55 }
  0xe6   : > { %v343_v56 = vpop.f32.mrf.mxu0 }
  0xe7   : > { %v356_v57 = vpop.f32.mrf.mxu1 }
  0xec   : > { %v370_v58 = vld [vmem:[#allocation2] sm:$0xf] }
  0xed   : > { %371 = vst [vmem:[%s223_s21] sm:$0xf] %v370_v58 }
  0xee PF: > { %s593_s28 = sshll.u32 %s878_s16, 2  ;;  %s386_s29 = sshll.u32 %s223_s21, 4  ;;  %s387_s29 = int_to_ptr.vmem [resolvable:$true] %s386_s29 }
  0xef   : > { %s384_s30 = scalar_lea.hbm %s1161_s2, %s593_s28  ;;  %s373_s15 = scalar_lea.sflag [#allocation5], %s221_s17 }
  0xf0   : > { %s388_s27 = sshll.u32 %s384_s30, 4  ;;  %s784_s23 = scalar_lea.hbm %s1161_s2, 8  ;;  %s389_s27 = int_to_ptr.hbm [resolvable:$true] %s388_s27 }
  0xf1   : > { %s778_s4 = sshra.s32 %s389_s27, 4  ;;  %s779_s4 = int_to_ptr.hbm [resolvable:$true] %s778_s4 }
  0xf2   : > { %s780_s26 = scalar_lea.hbm %s779_s4, 4  ;;  %p785_p12 = scmp.lt.s32.totalorder %s779_s4, %s1161_s2 }
  0xf3   : > { %p781_p9 = scmp.ne.s32.totalorder %s779_s4, %s780_s26  ;;  %p786_p0 = scmp.lt.s32.totalorder %s784_s23, %s780_s26 }
  0xf5   : > { %p782_p10 = pnand %p781_p9, %p999_p13  ;;  %p787_p1 = por %p786_p0, %p785_p12 }
  0xf7   : > { %p783_p11 = pneg %p782_p10 }
  0xf9   : > { %p788_p3 = pnand %p787_p1, %p783_p11 }
  0xfb   : > { %791 = shalt.err (!%p788_p3)
}
  0xfc   : > { %598 = dma.vmem_to_hbm [thread:$0]  (%p999_p13), %s387_s29, 64, %s389_s27, %s373_s15  }
  0xfd PF: > { %p612_p4 = scmp.ge.s32.totalorder %s890_s19, 2  ;;  %s400_s12 = sand.u32 1, %s850_s9  }
  0xfe   : > { %s401_s0 = scalar_lea.sflag [#allocation5], %s400_s12 }
  0xff   : > { %p608_p6 = pnand %p612_p4, %p1015_p2 }
 0x101   : > { %p609_p8 = pneg %p608_p6 }
 0x103   : > { %845 = dma.done.wait (%p609_p8), %s401_s0, 64  }
 0x104   : > { %847 = vsyncadd (%p609_p8), %s401_s0, 4294967232  ;;  %s21_s19 = sadd.s32 1, %s890_s19   ;;  %s1177_s15 = sld [smem:[#allocation12_spill]] }
 0x105   : > { %p18_p5 = scmp.ge.s32.totalorder %s21_s19, 8   ;;  %s1178_s16 = sld [smem:[#allocation13_spill]] }
 0x106   : > { %s1179_s17 = sld [smem:[#allocation14_spill]]  ;;  %s1181_s9 = smov %s854_s10 }
 0x107   : > { %s1180_s18 = sld [smem:[#allocation15_spill]]  ;;  %s1182_s10 = smov %s858_s11 }
 0x108   : > { %s1183_s11 = smov %s1004_s7  ;;  %s1184_s12 = smov %s866_s13 }
 0x109   : > { %s1185_s13 = smov %s870_s14  ;;  %s1186_s14 = smov %s1007_s8 }
 0x10a   :  { %20 = sbr.rel (!%p18_p5) target bundleno = 13 (0xd), region = 94 }
 0x10f   :  { %407 = vsyncpa [#allocation4], 1 }
 0x110   :  { %409 = vsyncpa [#allocation4 + $0x1], 1 }
 0x111   :  { %410 = vsyncpa [#allocation7], 1 }
 0x112   :  { %412 = vsyncpa [#allocation7 + $0x1], 1 }
 0x113   :  { %413 = vsyncpa [#allocation5], 1 }
 0x114   :  { %415 = vsyncpa [#allocation5 + $0x1], 1 }

</bundles_post_ra>
